<compile_context>
chip_gen: v7x
topology: tpu7x:2x2x1
jax: 0.10.0
libtpu: 0.0.40
codegen_flags: <defaults>
</compile_context>

<pallas_src>
import jax
import jax.numpy as jnp
from jax.experimental import pallas as pl
from jax.experimental.pallas import tpu as pltpu


def _round_up(v, m):
    return (v + m - 1) // m * m


# ----------------------------------------------------------------------------
# Kernel
# ----------------------------------------------------------------------------
def _build_kernel(num_layers, residuallinks_input, residuallinks_output,
                  pooling_operation, n_valid, tn, need_mask):
    """Fused SLP stack + residual links + tiled pooling for one (b, s, n) tile.

    Ref order: grouped_input_tile, (w_i, shift_i) per layer, out_ref, acc_scratch.
    Weights are [C_out, C_in] bf16 with the BN scale pre-folded; shifts are
    [C_out, 1] f32 (BN shift + conv bias).
    """
    assert pooling_operation in ('max', 'sum')
    is_max = (pooling_operation == 'max')
    # Neutral element of the pooling op. -inf for 'max' keeps the kernel correct
    # even if a residual configuration makes the pooled tensor negative.
    neutral = float('-inf') if is_max else 0.0

    def kernel(g_ref, *rest):
        out_ref, acc_ref = rest[-2], rest[-1]
        prefs = rest[:-2]

        s = pl.program_id(1)          # core-split index (v7x 2nd-TC work)
        n = pl.program_id(2)          # point-tile index within the split
        n_tiles = pl.num_programs(2)

        h0 = g_ref[0]                 # [Cg, TN] bf16 (channels on sublanes)

        # list_x mirrors the PyTorch list_x_complete bookkeeping. Entries that
        # no residual link references (e.g. the raw-input f32 cast) are dead
        # code and are DCE'd, so intermediates only stay live while needed.
        list_x = [h0.astype(jnp.float32)]
        offset = 0

        def maybe_residual(i):
            nonlocal offset
            hits = [j for j, e in enumerate(residuallinks_output) if e == i]
            if len(hits) == 1:
                list_x.append(list_x[i + 1 + offset]
                              + list_x[residuallinks_input[hits[0]] + offset])
                offset += 1

        for i in range(num_layers):
            w = prefs[2 * i][...]          # [C_out, C_in] bf16 (BN scale folded)
            b = prefs[2 * i + 1][...]      # [C_out, 1]  f32  (BN shift + bias)
            if i == 0:
                operand = h0               # already bf16; single K=Cg dot
            else:
                operand = list_x[i + offset].astype(jnp.bfloat16)
            y = jnp.dot(w, operand, preferred_element_type=jnp.float32)
            y = jnp.maximum(y + b, 0.0)    # folded-BN affine + ReLU  [C_out, TN]
            list_x.append(y)
            maybe_residual(i)

        final = list_x[num_layers + offset]     # [C_last, TN] f32

        # ---- tiled pooling: pure lane-dense VPU accumulate into VMEM scratch;
        # the cross-lane (XLU) reduce + output store only happen in the epilogue.
        @pl.when(n == 0)
        def _():
            acc_ref[...] = jnp.full(acc_ref.shape, neutral, acc_ref.dtype)

        def combine(val):
            if is_max:
                acc_ref[...] = jnp.maximum(acc_ref[...], val)
            else:
                acc_ref[...] = acc_ref[...] + val

        if need_mask:
            g = s * n_tiles + n              # global point-tile index
            tile_has_pad = (g + 1) * tn > n_valid

            @pl.when(jnp.logical_not(tile_has_pad))
            def _():
                combine(final)               # fully-valid tile: no iota/select

            @pl.when(tile_has_pad)
            def _():
                lane = jax.lax.broadcasted_iota(jnp.int32, final.shape, 1)
                valid = (g * tn + lane) < n_valid
                combine(jnp.where(valid, final, neutral))
        else:
            combine(final)

        @pl.when(n == n_tiles - 1)
        def _():
            if is_max:
                red = jnp.max(acc_ref[...], axis=1, keepdims=True)   # [C_last, 1]
            else:
                red = jnp.sum(acc_ref[...], axis=1, keepdims=True)
            out_ref[0, 0] = red              # once per (batch, split)

    return kernel


# ----------------------------------------------------------------------------
# Wrapper (layout plumbing, BN folding, pallas_call)
# ----------------------------------------------------------------------------
def pointnet_set_collapse(x, x_complete, params, *, use_x,
                          residuallinks_input, residuallinks_output,
                          pooling_operation, tn=2048, core_splits=None):
    """Forward pass.

    x:          [B, N, in_channels]            (point coordinates)
    x_complete: [B, N, in_channels_complete]   (point features)
    params:     per-layer dicts {'w': [Cin,Cout], 'scale': [1,Cout], 'shift': [1,Cout]}

    Returns (subsampled_centroids [B,1,in_channels], x_out [B,1,C_last]).
    """
    assert pooling_operation in ('max', 'sum')
    B, N, Cx = x.shape

    # Grouping_all: the single "all points" group's centroid is the origin.
    subsampled_centroids = jnp.zeros((B, 1, Cx), dtype=x.dtype)

    # v7x has 2 TensorCores; when the batch axis cannot feed both, split the
    # point axis into per-core partial reductions combined in the wrapper.
    if core_splits is None:
        core_splits = 2 if B == 1 else 1
    S = max(1, int(core_splits))

    # Point-tile size: multiple of 256 lanes (full MXU width on v6e/v7x; also a
    # multiple of 128 for v5e), big enough to amortize per-grid-step overhead,
    # capped so small clouds stay a single tile.
    tn = _round_up(max(256, min(int(tn), _round_up(N, 256))), 256)
    n_pad = _round_up(N, S * tn)
    n_per_split = n_pad // (S * tn)
    need_mask = (n_pad != N)

    # One concatenated [B, Cg, N_pad] bf16 slab: concat + transpose + cast + pad
    # fuse into a single XLA pass, and the kernel issues exactly one input DMA
    # per tile (channels on sublanes, points on lanes -> lane-dense VPU work).
    g = jnp.concatenate([x_complete, x], axis=-1) if use_x else x_complete
    Cg = g.shape[-1]
    g = jnp.transpose(g, (0, 2, 1)).astype(jnp.bfloat16)
    if n_pad != N:
        g = jnp.pad(g, ((0, 0), (0, 0), (0, n_pad - N)))

    flat_inputs = [g]
    in_specs = [pl.BlockSpec((1, Cg, tn),
                             lambda b, s, n: (b, 0, s * n_per_split + n))]

    num_layers = len(params)
    d_last = params[-1]['w'].shape[-1]

    # Fold the BN scale into the conv weights, transpose to [C_out, C_in], bf16.
    for p in params:
        w_f = (p['w'] * p['scale']).T.astype(jnp.bfloat16)       # [C_out, C_in]
        shift = p['shift'].reshape(-1, 1).astype(jnp.float32)    # [C_out, 1]
        for arr in (w_f, shift):
            flat_inputs.append(arr)
            in_specs.append(pl.BlockSpec(arr.shape, lambda b, s, n: (0, 0)))

    kernel = _build_kernel(num_layers,
                           tuple(int(r) for r in residuallinks_input),
                           tuple(int(r) for r in residuallinks_output),
                           pooling_operation, N, tn, need_mask)

    out = pl.pallas_call(
        kernel,
        grid=(B, S, n_per_split),
        in_specs=in_specs,
        # Same output block for every n -> resident partial result across the
        # point-tile (reduction) axis; distinct per (batch, split).
        out_specs=pl.BlockSpec((1, 1, d_last, 1), lambda b, s, n: (b, s, 0, 0)),
        out_shape=jax.ShapeDtypeStruct((B, S, d_last, 1), jnp.float32),
        scratch_shapes=[pltpu.VMEM((d_last, tn), jnp.float32)],
        compiler_params=pltpu.CompilerParams(
            dimension_semantics=("parallel", "parallel", "arbitrary")),
    )(*flat_inputs)

    # Combine per-split partials (tiny [B, S, C] tensor) and flip to [B, 1, C]
    # (both are metadata-cheap XLA ops on a few hundred elements).
    partials = out[..., 0]                                   # [B, S, C_last]
    if pooling_operation == 'max':
        pooled = jnp.max(partials, axis=1)
    else:
        pooled = jnp.sum(partials, axis=1)
    return subsampled_centroids, pooled[:, None, :]


# ----------------------------------------------------------------------------
# Deterministic parameter init (shapes from the module's __init__), BN folded.
# ----------------------------------------------------------------------------
def init_params(key, in_channels, in_channels_complete, use_x, list_dim_slp,
                eps=1e-5):
    last = in_channels_complete + (in_channels if use_x else 0)
    params = []
    for out_c in list_dim_slp:
        key, k1, k2, k3, k4, k5, k6 = jax.random.split(key, 7)
        bound = 1.0 / (last ** 0.5)
        # PyTorch Conv1d weight is [out_c, last, 1]; we store its [last, out_c] transpose.
        w = jax.random.uniform(k1, (last, out_c), jnp.float32, -bound, bound)
        bias = jax.random.uniform(k2, (out_c,), jnp.float32, -bound, bound)
        gamma = 1.0 + 0.1 * jax.random.normal(k3, (out_c,), jnp.float32)
        beta = 0.1 * jax.random.normal(k4, (out_c,), jnp.float32)
        running_mean = 0.1 * jax.random.normal(k5, (out_c,), jnp.float32)
        running_var = 1.0 + 0.1 * jax.random.uniform(k6, (out_c,), jnp.float32)
        scale = gamma / jnp.sqrt(running_var + eps)
        shift = beta - running_mean * scale + bias * scale
        params.append(dict(w=w,
                           scale=scale.reshape(1, out_c),
                           shift=shift.reshape(1, out_c)))
        last = out_c
    return params


# ----------------------------------------------------------------------------
# Pure-JAX reference (bf16 matmul operands, f32 accumulation — matches kernel)
# ----------------------------------------------------------------------------
def reference(x, x_complete, params, *, use_x, residuallinks_input,
              residuallinks_output, pooling_operation):
    grouped = jnp.concatenate([x_complete, x], axis=-1) if use_x else x_complete
    list_x = [grouped.astype(jnp.float32)]
    offset = 0
    L = len(params)
    for i in range(L):
        p = params[i]
        h = list_x[i + offset]
        w_f = (p['w'] * p['scale']).astype(jnp.bfloat16)
        y = jnp.einsum('bnc,co->bno', h.astype(jnp.bfloat16), w_f,
                       preferred_element_type=jnp.float32)
        y = jnp.maximum(y + p['shift'], 0.0)
        list_x.append(y)
        hits = [k for k, e in enumerate(residuallinks_output) if e == i]
        if len(hits) == 1:
            list_x.append(list_x[i + 1 + offset]
                          + list_x[residuallinks_input[hits[0]] + offset])
            offset += 1
    final = list_x[L + offset]
    if pooling_operation == 'max':
        pooled = jnp.max(final, axis=1)
    else:
        pooled = jnp.sum(final, axis=1)
    return pooled[:, None, :]


# ----------------------------------------------------------------------------
def _run_case(name, key, *, B, N, in_channels, in_channels_complete, use_x,
              list_dim_slp, residuallinks_input, residuallinks_output,
              pooling_operation, tn=2048, atol=2e-2, rtol=2e-2):
    kx, kc, kp = jax.random.split(key, 3)
    x = jax.random.normal(kx, (B, N, in_channels), jnp.float32)
    x_complete = jax.random.normal(kc, (B, N, in_channels_complete), jnp.float32)
    params = init_params(kp, in_channels, in_channels_complete, use_x, list_dim_slp)

    centroids, out = pointnet_set_collapse(
        x, x_complete, params, use_x=use_x,
        residuallinks_input=residuallinks_input,
        residuallinks_output=residuallinks_output,
        pooling_operation=pooling_operation, tn=tn)
    out = jax.block_until_ready(out)
    centroids = jax.block_until_ready(centroids)

    assert centroids.shape == (B, 1, in_channels), name
    assert out.shape == (B, 1, list_dim_slp[-1]), name

    ref = reference(x, x_complete, params, use_x=use_x,
                    residuallinks_input=residuallinks_input,
                    residuallinks_output=residuallinks_output,
                    pooling_operation=pooling_operation)
    err = jnp.max(jnp.abs(out - ref))
    assert jnp.allclose(out, ref, atol=atol, rtol=rtol), (
        f"{name}: max abs err {err}")


if __name__ == "__main__":
    key = jax.random.PRNGKey(0)
    k1, k2, k3 = jax.random.split(key, 3)

    # Small base case: B=2, N=16, max pooling, residual link, single tile.
    _run_case("case1_max_residual", k1, B=2, N=16, in_channels=3,
              in_channels_complete=4, use_x=True, list_dim_slp=[32, 32, 64],
              residuallinks_input=[1], residuallinks_output=[1],
              pooling_operation='max')

    # B=1 -> 2-way core split (v7x path), multi-tile reduction, padded tail, max.
    _run_case("case2_max_split", k2, B=1, N=600, in_channels=3,
              in_channels_complete=4, use_x=True, list_dim_slp=[32, 32, 64],
              residuallinks_input=[1], residuallinks_output=[1],
              pooling_operation='max', tn=256)

    # 'sum' pooling, use_x=False, no residual links, padded tail.
    _run_case("case3_sum_nox", k3, B=2, N=300, in_channels=3,
              in_channels_complete=4, use_x=False, list_dim_slp=[16, 32],
              residuallinks_input=[], residuallinks_output=[],
              pooling_operation='sum', tn=256, atol=5e-2, rtol=2e-2)

    print("KERNEL_OK")
</pallas_src>

<mosaic_0001>
module attributes {stable_mosaic.version = 11 : i64} {
  func.func @kernel(%arg0: i32, %arg1: i32, %arg2: i32, %arg3: memref<1x7x256xbf16, #tpu.memory_space<vmem>>, %arg4: memref<32x7xbf16, #tpu.memory_space<vmem>>, %arg5: memref<32x1xf32, #tpu.memory_space<vmem>>, %arg6: memref<32x32xbf16, #tpu.memory_space<vmem>>, %arg7: memref<32x1xf32, #tpu.memory_space<vmem>>, %arg8: memref<64x32xbf16, #tpu.memory_space<vmem>>, %arg9: memref<64x1xf32, #tpu.memory_space<vmem>>, %arg10: memref<1x1x64x1xf32, #tpu.memory_space<vmem>>, %arg11: memref<64x256xf32, #tpu.memory_space<vmem>>) attributes {dimension_semantics = [#tpu.dimension_semantics<parallel>, #tpu.dimension_semantics<parallel>, #tpu.dimension_semantics<arbitrary>], iteration_bounds = array<i64: 2, 1, 1>, scalar_prefetch = 0 : i64, scratch_operands = 1 : i64, tpu.core_type = #tpu.core_type<tc>, window_params = [{transform_indices = @transform_0, window_bounds = array<i64: 1, 7, 256>}, {pipeline_mode = #tpu.pipeline_mode<synchronous>, transform_indices = @transform_1, window_bounds = array<i64: 32, 7>}, {pipeline_mode = #tpu.pipeline_mode<synchronous>, transform_indices = @transform_2, window_bounds = array<i64: 32, 1>}, {pipeline_mode = #tpu.pipeline_mode<synchronous>, transform_indices = @transform_3, window_bounds = array<i64: 32, 32>}, {pipeline_mode = #tpu.pipeline_mode<synchronous>, transform_indices = @transform_4, window_bounds = array<i64: 32, 1>}, {pipeline_mode = #tpu.pipeline_mode<synchronous>, transform_indices = @transform_5, window_bounds = array<i64: 64, 32>}, {pipeline_mode = #tpu.pipeline_mode<synchronous>, transform_indices = @transform_6, window_bounds = array<i64: 64, 1>}, {transform_indices = @transform_7, window_bounds = array<i64: 1, 1, 64, 1>}]} {
    %c0 = arith.constant 0 : index
    %c0_0 = arith.constant 0 : index
    %c0_1 = arith.constant 0 : index
    %0 = vector.load %arg3[%c0, %c0_0, %c0_1] : memref<1x7x256xbf16, #tpu.memory_space<vmem>>, vector<1x7x256xbf16>
    %1 = vector.shape_cast %0 : vector<1x7x256xbf16> to vector<7x256xbf16>
    %c0_2 = arith.constant 0 : index
    %c0_3 = arith.constant 0 : index
    %2 = vector.load %arg4[%c0_2, %c0_3] : memref<32x7xbf16, #tpu.memory_space<vmem>>, vector<32x7xbf16>
    %c0_4 = arith.constant 0 : index
    %c0_5 = arith.constant 0 : index
    %3 = vector.load %arg5[%c0_4, %c0_5] : memref<32x1xf32, #tpu.memory_space<vmem>>, vector<32x1xf32>
    %cst = arith.constant dense<0.000000e+00> : vector<32x256xf32>
    %4 = tpu.matmul %2, %1, %cst {dimension_numbers = #tpu.dot_dimension_numbers<[1], [0], [0], [1], [0, 0, 1, 1], [], []>} : vector<32x7xbf16>, vector<7x256xbf16>, vector<32x256xf32> -> vector<32x256xf32>
    %5 = vector.broadcast %3 : vector<32x1xf32> to vector<32x256xf32>
    %6 = arith.addf %4, %5 : vector<32x256xf32>
    %cst_6 = arith.constant 0.000000e+00 : f32
    %7 = vector.broadcast %cst_6 : f32 to vector<32x256xf32>
    %8 = arith.maximumf %6, %7 : vector<32x256xf32>
    %c0_7 = arith.constant 0 : index
    %c0_8 = arith.constant 0 : index
    %9 = vector.load %arg6[%c0_7, %c0_8] : memref<32x32xbf16, #tpu.memory_space<vmem>>, vector<32x32xbf16>
    %c0_9 = arith.constant 0 : index
    %c0_10 = arith.constant 0 : index
    %10 = vector.load %arg7[%c0_9, %c0_10] : memref<32x1xf32, #tpu.memory_space<vmem>>, vector<32x1xf32>
    %11 = arith.truncf %8 : vector<32x256xf32> to vector<32x256xbf16>
    %cst_11 = arith.constant dense<0.000000e+00> : vector<32x256xf32>
    %12 = tpu.matmul %9, %11, %cst_11 {dimension_numbers = #tpu.dot_dimension_numbers<[1], [0], [0], [1], [0, 0, 1, 1], [], []>} : vector<32x32xbf16>, vector<32x256xbf16>, vector<32x256xf32> -> vector<32x256xf32>
    %13 = vector.broadcast %10 : vector<32x1xf32> to vector<32x256xf32>
    %14 = arith.addf %12, %13 : vector<32x256xf32>
    %cst_12 = arith.constant 0.000000e+00 : f32
    %15 = vector.broadcast %cst_12 : f32 to vector<32x256xf32>
    %16 = arith.maximumf %14, %15 : vector<32x256xf32>
    %17 = arith.addf %16, %8 : vector<32x256xf32>
    %c0_13 = arith.constant 0 : index
    %c0_14 = arith.constant 0 : index
    %18 = vector.load %arg8[%c0_13, %c0_14] : memref<64x32xbf16, #tpu.memory_space<vmem>>, vector<64x32xbf16>
    %c0_15 = arith.constant 0 : index
    %c0_16 = arith.constant 0 : index
    %19 = vector.load %arg9[%c0_15, %c0_16] : memref<64x1xf32, #tpu.memory_space<vmem>>, vector<64x1xf32>
    %20 = arith.truncf %17 : vector<32x256xf32> to vector<32x256xbf16>
    %cst_17 = arith.constant dense<0.000000e+00> : vector<64x256xf32>
    %21 = tpu.matmul %18, %20, %cst_17 {dimension_numbers = #tpu.dot_dimension_numbers<[1], [0], [0], [1], [0, 0, 1, 1], [], []>} : vector<64x32xbf16>, vector<32x256xbf16>, vector<64x256xf32> -> vector<64x256xf32>
    %22 = vector.broadcast %19 : vector<64x1xf32> to vector<64x256xf32>
    %23 = arith.addf %21, %22 : vector<64x256xf32>
    %cst_18 = arith.constant 0.000000e+00 : f32
    %24 = vector.broadcast %cst_18 : f32 to vector<64x256xf32>
    %25 = arith.maximumf %23, %24 : vector<64x256xf32>
    %c0_i32 = arith.constant 0 : i32
    %26 = arith.cmpi eq, %arg2, %c0_i32 : i32
    %27 = arith.extui %26 : i1 to i32
    %c0_i32_19 = arith.constant 0 : i32
    %28 = arith.cmpi ne, %27, %c0_i32_19 : i32
    scf.if %28 {
      %cst_25 = arith.constant 0xFF800000 : f32
      %42 = vector.broadcast %cst_25 : f32 to vector<64x256xf32>
      %c0_26 = arith.constant 0 : index
      %c0_27 = arith.constant 0 : index
      %43 = vector.load %arg11[%c0_26, %c0_27] : memref<64x256xf32, #tpu.memory_space<vmem>>, vector<64x256xf32>
      tpu.vector_store %arg11[%c0_26, %c0_27], %42 {strides = array<i32>} : memref<64x256xf32, #tpu.memory_space<vmem>>, vector<64x256xf32>,
    } else {
    }
    %c1_i32 = arith.constant 1 : i32
    %29 = arith.muli %arg1, %c1_i32 : i32
    %30 = arith.addi %29, %arg2 : i32
    %c1_i32_20 = arith.constant 1 : i32
    %31 = arith.addi %30, %c1_i32_20 : i32
    %c256_i32 = arith.constant 256 : i32
    %32 = arith.muli %31, %c256_i32 : i32
    %c16_i32 = arith.constant 16 : i32
    %33 = arith.cmpi sgt, %32, %c16_i32 : i32
    %true = arith.constant true
    %34 = arith.xori %33, %true : i1
    %35 = arith.extui %34 : i1 to i32
    %c0_i32_21 = arith.constant 0 : i32
    %36 = arith.cmpi ne, %35, %c0_i32_21 : i32
    scf.if %36 {
      %c0_25 = arith.constant 0 : index
      %c0_26 = arith.constant 0 : index
      %42 = vector.load %arg11[%c0_25, %c0_26] : memref<64x256xf32, #tpu.memory_space<vmem>>, vector<64x256xf32>
      %43 = arith.maximumf %42, %25 : vector<64x256xf32>
      %c0_27 = arith.constant 0 : index
      %c0_28 = arith.constant 0 : index
      %44 = vector.load %arg11[%c0_27, %c0_28] : memref<64x256xf32, #tpu.memory_space<vmem>>, vector<64x256xf32>
      tpu.vector_store %arg11[%c0_27, %c0_28], %43 {strides = array<i32>} : memref<64x256xf32, #tpu.memory_space<vmem>>, vector<64x256xf32>,
    } else {
    }
    %37 = arith.extui %33 : i1 to i32
    %c0_i32_22 = arith.constant 0 : i32
    %38 = arith.cmpi ne, %37, %c0_i32_22 : i32
    scf.if %38 {
      %42 = tpu.iota {dimensions = array<i32: 1>} : vector<64x256xi32>
      %c256_i32_25 = arith.constant 256 : i32
      %43 = arith.muli %30, %c256_i32_25 : i32
      %44 = vector.broadcast %43 : i32 to vector<64x256xi32>
      %45 = arith.addi %44, %42 : vector<64x256xi32>
      %c16_i32_26 = arith.constant 16 : i32
      %46 = vector.broadcast %c16_i32_26 : i32 to vector<64x256xi32>
      %47 = arith.cmpi slt, %45, %46 : vector<64x256xi32>
      %cst_27 = arith.constant 0xFF800000 : f32
      %48 = vector.broadcast %cst_27 : f32 to vector<64x256xf32>
      %49 = arith.select %47, %25, %48 : vector<64x256xi1>, vector<64x256xf32>
      %c0_28 = arith.constant 0 : index
      %c0_29 = arith.constant 0 : index
      %50 = vector.load %arg11[%c0_28, %c0_29] : memref<64x256xf32, #tpu.memory_space<vmem>>, vector<64x256xf32>
      %51 = arith.maximumf %50, %49 : vector<64x256xf32>
      %c0_30 = arith.constant 0 : index
      %c0_31 = arith.constant 0 : index
      %52 = vector.load %arg11[%c0_30, %c0_31] : memref<64x256xf32, #tpu.memory_space<vmem>>, vector<64x256xf32>
      tpu.vector_store %arg11[%c0_30, %c0_31], %51 {strides = array<i32>} : memref<64x256xf32, #tpu.memory_space<vmem>>, vector<64x256xf32>,
    } else {
    }
    %c0_i32_23 = arith.constant 0 : i32
    %39 = arith.cmpi eq, %arg2, %c0_i32_23 : i32
    %40 = arith.extui %39 : i1 to i32
    %c0_i32_24 = arith.constant 0 : i32
    %41 = arith.cmpi ne, %40, %c0_i32_24 : i32
    scf.if %41 {
      %c0_25 = arith.constant 0 : index
      %c0_26 = arith.constant 0 : index
      %42 = vector.load %arg11[%c0_25, %c0_26] : memref<64x256xf32, #tpu.memory_space<vmem>>, vector<64x256xf32>
      %cst_27 = arith.constant dense<0xFF800000> : vector<64xf32>
      %43 = vector.multi_reduction <maximumf>, %42, %cst_27 [1] : vector<64x256xf32> to vector<64xf32>
      %44 = vector.shape_cast %43 : vector<64xf32> to vector<64x1xf32>
      %c0_28 = arith.constant 0 : index
      %c0_29 = arith.constant 0 : index
      %c0_30 = arith.constant 0 : index
      %c0_31 = arith.constant 0 : index
      %45 = vector.load %arg10[%c0_28, %c0_29, %c0_30, %c0_31] : memref<1x1x64x1xf32, #tpu.memory_space<vmem>>, vector<1x1x64x1xf32>
      %46 = vector.shape_cast %45 : vector<1x1x64x1xf32> to vector<64x1xf32>
      %47 = vector.shape_cast %44 : vector<64x1xf32> to vector<1x1x64x1xf32>
      tpu.vector_store %arg10[%c0_28, %c0_29, %c0_30, %c0_31], %47 {strides = array<i32>} : memref<1x1x64x1xf32, #tpu.memory_space<vmem>>, vector<1x1x64x1xf32>,
    } else {
    }
    return
  }
  func.func @transform_0(%arg0: i32, %arg1: i32, %arg2: i32) -> (i32, i32, i32) {
    %c1_i32 = arith.constant 1 : i32
    %0 = arith.muli %arg1, %c1_i32 : i32
    %1 = arith.addi %0, %arg2 : i32
    %c0_i32 = arith.constant 0 : i32
    %c0_i32_0 = arith.constant 0 : i32
    return %arg0, %c0_i32, %1 : i32, i32, i32
  }
  func.func @transform_1(%arg0: i32, %arg1: i32, %arg2: i32) -> (i32, i32) {
    %c0_i32 = arith.constant 0 : i32
    %c0_i32_0 = arith.constant 0 : i32
    %c0_i32_1 = arith.constant 0 : i32
    return %c0_i32, %c0_i32_0 : i32, i32
  }
  func.func @transform_2(%arg0: i32, %arg1: i32, %arg2: i32) -> (i32, i32) {
    %c0_i32 = arith.constant 0 : i32
    %c0_i32_0 = arith.constant 0 : i32
    %c0_i32_1 = arith.constant 0 : i32
    return %c0_i32, %c0_i32_0 : i32, i32
  }
  func.func @transform_3(%arg0: i32, %arg1: i32, %arg2: i32) -> (i32, i32) {
    %c0_i32 = arith.constant 0 : i32
    %c0_i32_0 = arith.constant 0 : i32
    %c0_i32_1 = arith.constant 0 : i32
    return %c0_i32, %c0_i32_0 : i32, i32
  }
  func.func @transform_4(%arg0: i32, %arg1: i32, %arg2: i32) -> (i32, i32) {
    %c0_i32 = arith.constant 0 : i32
    %c0_i32_0 = arith.constant 0 : i32
    %c0_i32_1 = arith.constant 0 : i32
    return %c0_i32, %c0_i32_0 : i32, i32
  }
  func.func @transform_5(%arg0: i32, %arg1: i32, %arg2: i32) -> (i32, i32) {
    %c0_i32 = arith.constant 0 : i32
    %c0_i32_0 = arith.constant 0 : i32
    %c0_i32_1 = arith.constant 0 : i32
    return %c0_i32, %c0_i32_0 : i32, i32
  }
  func.func @transform_6(%arg0: i32, %arg1: i32, %arg2: i32) -> (i32, i32) {
    %c0_i32 = arith.constant 0 : i32
    %c0_i32_0 = arith.constant 0 : i32
    %c0_i32_1 = arith.constant 0 : i32
    return %c0_i32, %c0_i32_0 : i32, i32
  }
  func.func @transform_7(%arg0: i32, %arg1: i32, %arg2: i32) -> (i32, i32, i32, i32) {
    %c0_i32 = arith.constant 0 : i32
    %c0_i32_0 = arith.constant 0 : i32
    %c0_i32_1 = arith.constant 0 : i32
    return %arg0, %arg1, %c0_i32, %c0_i32_0 : i32, i32, i32, i32
  }
}

</mosaic_0001>

<bundles_post_ra>
// kernel: tpu_custom_call.1
= control target key start
LH: loop header
LB: loop body
LE: loop exit
PB: predicated region body
PF: predicated region fallthrough
CT: control target
= control target key end

     0   :  { %s1184_s24 = smov 0   ;;  %s1186_s25 = smov 0   ;;  %s1327_s0 = inlined_call_operand.vmem [shape: bf16[2,7,256], index: 0, kind: input, shape index: {}]   ;;  %s1328_s1 = inlined_call_operand.vmem [shape: bf16[32,7], index: 1, kind: input, shape index: {}]   ;;  %s1329_s2 = inlined_call_operand.vmem [shape: f32[32,1], index: 2, kind: input, shape index: {}]   ;;  %s1330_s3 = inlined_call_operand.vmem [shape: bf16[32,32], index: 3, kind: input, shape index: {}]   ;;  %s1331_s4 = inlined_call_operand.vmem [shape: f32[32,1], index: 4, kind: input, shape index: {}]   ;;  %s1332_s5 = inlined_call_operand.vmem [shape: bf16[64,32], index: 5, kind: input, shape index: {}]   ;;  %s1333_s6 = inlined_call_operand.vmem [shape: f32[64,1], index: 6, kind: input, shape index: {}]   ;;  %s1334_s7 = inlined_call_operand.vmem [shape: f32[2,1,64,1], index: 7, kind: output, shape index: {}]  }
   0x1   :  { %s1188_s26 = smov 0  }
   0x2 LB: > { %s36_s27 = sadd.s32 1, %s1136_s25  ;;  %p1053_p0 = scmp.ge.s32.totalorder %s1140_s26, 1  ;;  %s1140_s26 = sphi %s1188_s26, %s17_s26   ;;  %s1136_s25 = sphi %s1186_s25, %s1336_s25   ;;  %s1132_s24 = sphi %s1184_s24, %s1335_s24  }
   0x3   : > { %p38_p1 = scmp.ge.s32.totalorder %s36_s27, 2  ;;  %p269_p2 = scmp.lt.s32.totalorder %s1140_s26, 3 }
   0x5   : > { %s1338_s27 = smov (%p38_p1, %s36_s27), 0  ;;  %p270_p3 = pnand %p1053_p0, %p269_p2 }
   0x6   : > { %p312_p4 = scmp.lt.s32.totalorder (!%p270_p3), %s1132_s24, 1  ;;  %vm383_vm0 = vcmask (!%p270_p3), 1042432   ;;  %v1142_v0 = vmov (!%p270_p3), 0   ;;  %vm384_vm1 = vcmask (!%p270_p3), 1043456   ;;  %v1143_v1 = vmov (!%p270_p3), 65535   ;;  %v337_v3 = vld [vmem:[%s1329_s2] sm:$0xff] (!%p270_p3) }
   0x7   : > { %273 = sbr.rel (%p270_p3) target bundleno = 880 (0x370), region = 48  ;;  %425 = vmatprep.mubr.bf16.mxu1 (!%p270_p3), %v1142_v0  ;;  %1106 = vset.pattern.permute.xlu0 (!%p270_p3), %v1142_v0  ;;  %v385_v2 = vsel (!%p270_p3), %vm383_vm0, 4294967295, %v1143_v1  ;;  %v339_v4 = vld [vmem:[%s1329_s2 + $0x10] sm:$0xff] (!%p270_p3)  ;;  %v338_v5 = vld [vmem:[%s1329_s2 + $0x8] sm:$0xff] (!%p270_p3)  ;;  %v340_v8 = vld [vmem:[%s1329_s2 + $0x18] sm:$0xff] (!%p270_p3)  ;;  %vm376_vm2 = vcmask (!%p270_p3), 56320  }
   0x8   : > { %1107 = vset.pattern.permute.xlu1 (!%p270_p3), %v1142_v0  ;;  %696 = vmatprep.mubr.bf16.mxu0 (!%p270_p3), %v1142_v0  ;;  %v386_v7 = vsel (!%p270_p3), %vm384_vm1, %v385_v2, 0  ;;  %v458_v11 = vld [vmem:[%s1331_s4] sm:$0xff] (!%p270_p3)  ;;  %v459_v12 = vld [vmem:[%s1331_s4 + $0x8] sm:$0xff] (!%p270_p3)  ;;  %v460_v16 = vld [vmem:[%s1331_s4 + $0x10] sm:$0xff] (!%p270_p3)  ;;  %vm496_vm3 = vcmask (!%p270_p3), 261120   ;;  %vm948_vm5 = vcmask (!%p270_p3), 7168  }
   0x9   : > { %343 = vperm.xlu0 (!%p270_p3), %1106, %v337_v3   ;;  %353 = vperm.xlu1 (!%p270_p3), %1107, %v339_v4   ;;  %v1110_v15 = vld [vmem:[%s1328_s1] sm:$0xff] (!%p270_p3)   ;;  %v461_v17 = vld [vmem:[%s1331_s4 + $0x18] sm:$0xff] (!%p270_p3)  ;;  %v581_v19 = vld [vmem:[%s1333_s6 + $0x8] sm:$0xff] (!%p270_p3) }
   0xa   : > { %v580_v18 = vld [vmem:[%s1333_s6] sm:$0xff] (!%p270_p3)  ;;  %v1111_v20 = vld [vmem:[%s1328_s1 + $0x8] sm:$0xff] (!%p270_p3)   ;;  %v582_v21 = vld [vmem:[%s1333_s6 + $0x10] sm:$0xff] (!%p270_p3) }
   0xb   : > { %v583_v22 = vld [vmem:[%s1333_s6 + $0x18] sm:$0xff] (!%p270_p3)  ;;  %v584_v23 = vld [vmem:[%s1333_s6 + $0x20] sm:$0xff] (!%p270_p3)  ;;  %v585_v24 = vld [vmem:[%s1333_s6 + $0x28] sm:$0xff] (!%p270_p3) }
   0xc   : > { %v586_v25 = vld [vmem:[%s1333_s6 + $0x30] sm:$0xff] (!%p270_p3)  ;;  %v587_v26 = vld [vmem:[%s1333_s6 + $0x38] sm:$0xff] (!%p270_p3)  ;;  %v1112_v59 = vld [vmem:[%s1330_s3] sm:$0xff] (!%p270_p3)  }
   0xd   : > { %348 = vperm.xlu0 (!%p270_p3), %1106, %v338_v5   ;;  %358 = vperm.xlu1 (!%p270_p3), %1107, %v340_v8   ;;  %v1113_v60 = vld [vmem:[%s1330_s3 + $0x8] sm:$0xff] (!%p270_p3)  }
   0xe   : > { %s1340_s24 = smov (!%p312_p4, %s1132_s24), 1 }
   0xf   : > { %s1078_s30 = sshll.u32 %s1340_s24, 3  ;;  %s1079_s19 = sshll.u32 %s1340_s24, 6 }
  0x10   : > { %s319_s12 = scalar_lea.vmem %s1327_s0, %s1078_s30  ;;  %s330_s22 = scalar_lea.vmem %s1334_s7, %s1079_s19 }
  0x11   : > { %v332_v6 = vld [vmem:[%s319_s12] sm:$0xff]  ;;  %468 = vperm.xlu0 %1106, %v458_v11   ;;  %473 = vperm.xlu1 %1107, %v459_v12  }
  0x12   : > { %v1061_v9 = vcombine.high %v332_v6, %v332_v6  ;;  %v1060_v10 = vcombine.low %v332_v6, %v332_v6 }
  0x14   : > { %v391_v13 = vand.u32 %v1061_v9, %v386_v7  ;;  %v388_v14 = vand.u32 %v1060_v10, %v386_v7 }
  0x15   : > { %478 = vperm.xlu0 %1106, %v460_v16   ;;  %483 = vperm.xlu1 %1107, %v461_v17  }
  0x16   : > { %393 = vmatprep.subr.bf16.mxu1 %v391_v13 }
  0x17   : > { %394 = vmatpush1.bf16.msra.mxu1 %v388_v14 }
  0x19   : > { %594 = vperm.xlu0 %1106, %v580_v18   ;;  %599 = vperm.xlu1 %1107, %v581_v19  }
  0x1a   : > { %1062 = vmatmul.mubr.msk.bf16.vlgmr.msra.gmra.mrb[0].mxu1 %vm376_vm2, %v1110_v15 }
  0x1b   : > { %435 = vmatprep.mubr.bf16.mxu1 %v1142_v0 }
  0x1d   : > { %604 = vperm.xlu0 %1106, %v582_v21   ;;  %609 = vperm.xlu1 %1107, %v583_v22  }
  0x21   : > { %614 = vperm.xlu0 %1106, %v584_v23   ;;  %619 = vperm.xlu1 %1107, %v585_v24  }
  0x22   : > { %1063 = vmatmul.mubr.msk.bf16.gmra.mrb[4].mxu1 %vm376_vm2, %v1111_v20 }
  0x23   : > { %535 = vmatprep.mubr.bf16.mxu1 %v1142_v0 }
  0x25   : > { %624 = vperm.xlu0 %1106, %v586_v25   ;;  %629 = vperm.xlu1 %1107, %v587_v26  }
  0x88   : > { %v344_v27 = vpop.permute.xlu0 %343  ;;  %v354_v36 = vpop.permute.xlu1 %353 }
  0x8c   : > { %v349_v30 = vpop.permute.xlu0 %348  ;;  %v359_v46 = vpop.permute.xlu1 %358 }
  0x90   : > { %v469_v61 = vpop.permute.xlu0 %468  ;;  %v474_v2 = vpop.permute.xlu1 %473 }
  0x94   : > { %v479_v14 = vpop.permute.xlu0 %478  ;;  %v484_v21 = vpop.permute.xlu1 %483 }
  0xed   : > { %v427_v28 = vpop.f32.mrb[0].mxu1 }
  0xee   : > { %v429_v29 = vpop.f32.mrb[1].mxu1  ;;  %v428_v33 = vadd.f32 %v427_v28, %v344_v27 }
  0xef   : > { %v430_v31 = vadd.f32 %v429_v29, %v344_v27  ;;  %v431_v32 = vpop.f32.mrb[2].mxu1 }
  0xf0   : > { %v432_v34 = vadd.f32 %v431_v32, %v349_v30  ;;  %v433_v35 = vpop.f32.mrb[3].mxu1  ;;  %v446_v41 = vmax.f32 %v428_v33, 0.0 }
  0xf1   : > { %v434_v37 = vadd.f32 %v433_v35, %v349_v30  ;;  %v447_v39 = vmax.f32 %v430_v31, 0.0 }
  0xf2   : > { %v448_v38 = vmax.f32 %v432_v34, 0.0 }
  0xf3   : > { %v449_v40 = vmax.f32 %v434_v37, 0.0 }
  0xf4   : > { %v462_v44 = vpack.c.bf16 %v448_v38, %v446_v41 }
  0xf5   : > { %v463_v42 = vpack.c.bf16 %v449_v40, %v447_v39  ;;  %v437_v43 = vpop.f32.mrb[4].mxu1 }
  0xf6   : > { %v439_v45 = vpop.f32.mrb[5].mxu1  ;;  %v438_v49 = vadd.f32 %v437_v43, %v354_v36 }
  0xf7   : > { %v440_v47 = vadd.f32 %v439_v45, %v354_v36  ;;  %v441_v48 = vpop.f32.mrb[6].mxu1  ;;  %503 = vmatprep.subr.bf16.mxu1 %v463_v42  ;;  %v832_v42 = vlaneseq }
  0xf8   : > { %v442_v50 = vadd.f32 %v441_v48, %v359_v46  ;;  %v443_v51 = vpop.f32.mrb[7].mxu1  ;;  %504 = vmatpush1.bf16.msra.mxu1 %v462_v44  ;;  %v450_v56 = vmax.f32 %v438_v49, 0.0  ;;  %v595_v44 = vpop.permute.xlu0 %594 }
  0xf9   : > { %v444_v52 = vadd.f32 %v443_v51, %v359_v46  ;;  %v451_v54 = vmax.f32 %v440_v47, 0.0  ;;  %v833_v43 = vand.u32 127, %v832_v42  ;;  %v600_v48 = vpop.permute.xlu1 %599 }
  0xfa   : > { %v452_v53 = vmax.f32 %v442_v50, 0.0 }
  0xfb   : > { %v453_v55 = vmax.f32 %v444_v52, 0.0  ;;  %vm839_vm4 = vcmp.lt.s32.totalorder %v833_v43, 16 }
  0xfc   : > { %v464_v58 = vpack.c.bf16 %v452_v53, %v450_v56 }
  0xfd   : > { %v465_v57 = vpack.c.bf16 %v453_v55, %v451_v54 }
  0xff   : > { %505 = vmatprep.subr.bf16.mxu1 %v465_v57 }
 0x100   : > { %506 = vmatpush1.bf16.msra.mxu1 %v464_v58 }
 0x103   : > { %1066 = vmatmul.mubr.msk.bf16.vlgmr.msra.gmra.mrb[8].mxu1 %vm496_vm3, %v1112_v59  ;;  %v610_v59 = vpop.permute.xlu1 %609 }
 0x104   : > { %545 = vmatprep.mubr.bf16.mxu1 %v1142_v0 }
 0x10b   : > { %1067 = vmatmul.mubr.msk.bf16.gmra.mrb[12].mxu1 %vm496_vm3, %v1113_v60 }
 0x1d6   : > { %v537_v62 = vpop.f32.mrb[8].mxu1 }
 0x1d7   : > { %v538_v63 = vadd.f32 %v537_v62, %v469_v61  ;;  %v539_v1 = vpop.f32.mrb[9].mxu1 }
 0x1d8   : > { %v540_v3 = vadd.f32 %v539_v1, %v469_v61  ;;  %v541_v4 = vpop.f32.mrb[10].mxu1 }
 0x1d9   : > { %v556_v5 = vmax.f32 %v538_v63, 0.0  ;;  %v542_v6 = vadd.f32 %v541_v4, %v474_v2  ;;  %v543_v7 = vpop.f32.mrb[11].mxu1 }
 0x1da   : > { %v557_v8 = vmax.f32 %v540_v3, 0.0  ;;  %v544_v9 = vadd.f32 %v543_v7, %v474_v2 }
 0x1db   : > { %v558_v10 = vmax.f32 %v542_v6, 0.0  ;;  %v564_v12 = vadd.f32 %v556_v5, %v446_v41  ;;  %v1117_v41 = vld [vmem:[%s1332_s5 + $0x18] sm:$0xff]  }
 0x1dc   : > { %v559_v11 = vmax.f32 %v544_v9, 0.0  ;;  %v565_v16 = vadd.f32 %v557_v8, %v447_v39  ;;  %v1115_v39 = vld [vmem:[%s1332_s5 + $0x8] sm:$0xff]   ;;  %v620_v8 = vpop.permute.xlu1 %619 }
 0x1dd   : > { %v566_v13 = vadd.f32 %v558_v10, %v448_v38  ;;  %v1114_v38 = vld [vmem:[%s1332_s5] sm:$0xff]  }
 0x1de   : > { %v547_v15 = vpop.f32.mrb[12].mxu1  ;;  %v567_v17 = vadd.f32 %v559_v11, %v449_v40  ;;  %v1116_v40 = vld [vmem:[%s1332_s5 + $0x10] sm:$0xff]  }
 0x1df   : > { %v548_v18 = vadd.f32 %v547_v15, %v479_v14  ;;  %v549_v19 = vpop.f32.mrb[13].mxu1  ;;  %v588_v20 = vpack.c.bf16 %v566_v13, %v564_v12 }
 0x1e0   : > { %v550_v22 = vadd.f32 %v549_v19, %v479_v14  ;;  %v551_v23 = vpop.f32.mrb[14].mxu1  ;;  %v589_v24 = vpack.c.bf16 %v567_v17, %v565_v16 }
 0x1e1   : > { %v560_v25 = vmax.f32 %v548_v18, 0.0  ;;  %v552_v26 = vadd.f32 %v551_v23, %v484_v21  ;;  %v553_v27 = vpop.f32.mrb[15].mxu1 }
 0x1e2   : > { %v561_v28 = vmax.f32 %v550_v22, 0.0  ;;  %v554_v29 = vadd.f32 %v553_v27, %v484_v21  ;;  %664 = vmatprep.subr.bf16.mxu0 %v589_v24 }
 0x1e3   : > { %v562_v30 = vmax.f32 %v552_v26, 0.0  ;;  %665 = vmatpush1.bf16.msra.mxu0 %v588_v20  ;;  %v568_v32 = vadd.f32 %v560_v25, %v450_v56  ;;  %v630_v20 = vpop.permute.xlu1 %629 }
 0x1e4   : > { %v563_v31 = vmax.f32 %v554_v29, 0.0  ;;  %v569_v34 = vadd.f32 %v561_v28, %v451_v54 }
 0x1e5   : > { %v570_v33 = vadd.f32 %v562_v30, %v452_v53 }
 0x1e6   : > { %v571_v35 = vadd.f32 %v563_v31, %v453_v55  ;;  %v605_v55 = vpop.permute.xlu0 %604 }
 0x1e7   : > { %v590_v36 = vpack.c.bf16 %v570_v33, %v568_v32 }
 0x1e8   : > { %v591_v37 = vpack.c.bf16 %v571_v35, %v569_v34 }
 0x1ea   : > { %666 = vmatprep.subr.bf16.mxu0 %v591_v37  ;;  %v615_v3 = vpop.permute.xlu0 %614 }
 0x1eb   : > { %667 = vmatpush1.bf16.msra.mxu0 %v590_v36 }
 0x1ee   : > { %1072 = vmatmul.mubr.msk.bf16.vlgmr.msra.gmra.mrb[0].mxu0 %vm496_vm3, %v1114_v38  ;;  %v625_v16 = vpop.permute.xlu0 %624 }
 0x1ef   : > { %706 = vmatprep.mubr.bf16.mxu0 %v1142_v0 }
 0x1f6   : > { %1073 = vmatmul.mubr.msk.bf16.gmra.mrb[4].mxu0 %vm496_vm3, %v1115_v39 }
 0x1f7   : > { %716 = vmatprep.mubr.bf16.mxu0 %v1142_v0 }
 0x1fe   : > { %1074 = vmatmul.mubr.msk.bf16.gmra.mrb[8].mxu0 %vm496_vm3, %v1116_v40 }
 0x1ff   : > { %726 = vmatprep.mubr.bf16.mxu0 %v1142_v0 }
 0x206   : > { %1075 = vmatmul.mubr.msk.bf16.gmra.mrb[12].mxu0 %vm496_vm3, %v1117_v41 }
 0x2c1   : > { %v698_v45 = vpop.f32.mrb[0].mxu0 }
 0x2c2   : > { %v699_v46 = vadd.f32 %v698_v45, %v595_v44  ;;  %v700_v47 = vpop.f32.mrb[1].mxu0 }
 0x2c3   : > { %v702_v49 = vpop.f32.mrb[2].mxu0 }
 0x2c4   : > { %v737_v50 = vmax.f32 %v699_v46, 0.0  ;;  %v703_v51 = vadd.f32 %v702_v49, %v600_v48  ;;  %v704_v52 = vpop.f32.mrb[3].mxu0 }
 0x2c6   : > { %v739_v53 = vmax.f32 %v703_v51, 0.0  ;;  %v841_v0 = vsel %vm839_vm4, %v737_v50, -inf }
 0x2c7   : > { %925 = vmax.xlane.f32.xlu0 %v841_v0 }
 0x2c8   : > { %v843_v54 = vsel %vm839_vm4, %v739_v53, -inf }
 0x2c9   : > { %v708_v56 = vpop.f32.mrb[4].mxu0  ;;  %928 = vmax.xlane.f32.xlu1 %v843_v54 }
 0x2ca   : > { %v709_v57 = vadd.f32 %v708_v56, %v605_v55  ;;  %v710_v58 = vpop.f32.mrb[5].mxu0 }
 0x2cb   : > { %v712_v60 = vpop.f32.mrb[6].mxu0 }
 0x2cc   : > { %v741_v61 = vmax.f32 %v709_v57, 0.0  ;;  %v713_v62 = vadd.f32 %v712_v60, %v610_v59  ;;  %v714_v63 = vpop.f32.mrb[7].mxu0 }
 0x2ce   : > { %v743_v1 = vmax.f32 %v713_v62, 0.0  ;;  %v845_v2 = vsel %vm839_vm4, %v741_v61, -inf }
 0x2cf   : > { %931 = vmax.xlane.f32.xlu0 %v845_v2 }
 0x2d0   : > { %v847_v7 = vsel %vm839_vm4, %v743_v1, -inf }
 0x2d1   : > { %v718_v4 = vpop.f32.mrb[8].mxu0 }
 0x2d2   : > { %v719_v5 = vadd.f32 %v718_v4, %v615_v3  ;;  %v720_v6 = vpop.f32.mrb[9].mxu0 }
 0x2d3   : > { %v722_v9 = vpop.f32.mrb[10].mxu0  ;;  %934 = vmax.xlane.f32.xlu0 %v847_v7 }
 0x2d4   : > { %v745_v10 = vmax.f32 %v719_v5, 0.0  ;;  %v723_v11 = vadd.f32 %v722_v9, %v620_v8  ;;  %v724_v12 = vpop.f32.mrb[11].mxu0 }
 0x2d6   : > { %v747_v13 = vmax.f32 %v723_v11, 0.0  ;;  %v849_v14 = vsel %vm839_vm4, %v745_v10, -inf }
 0x2d7   : > { %937 = vmax.xlane.f32.xlu1 %v849_v14 }
 0x2d8   : > { %v851_v15 = vsel %vm839_vm4, %v747_v13, -inf }
 0x2d9   : > { %v728_v17 = vpop.f32.mrb[12].mxu0  ;;  %940 = vmax.xlane.f32.xlu0 %v851_v15 }
 0x2da   : > { %v729_v18 = vadd.f32 %v728_v17, %v625_v16  ;;  %v730_v19 = vpop.f32.mrb[13].mxu0 }
 0x2db   : > { %v732_v21 = vpop.f32.mrb[14].mxu0 }
 0x2dc   : > { %v749_v22 = vmax.f32 %v729_v18, 0.0  ;;  %v733_v23 = vadd.f32 %v732_v21, %v630_v20  ;;  %v734_v24 = vpop.f32.mrb[15].mxu0 }
 0x2de   : > { %v751_v25 = vmax.f32 %v733_v23, 0.0  ;;  %v853_v26 = vsel %vm839_vm4, %v749_v22, -inf }
 0x2df   : > { %943 = vmax.xlane.f32.xlu1 %v853_v26 }
 0x2e0   : > { %v855_v27 = vsel %vm839_vm4, %v751_v25, -inf }
 0x2e1   : > { %946 = vmax.xlane.f32.xlu0 %v855_v27 }
 0x354   : > { %v926_v28 = vpop.xlane.xlu0 %925 }
 0x355   : > { %949 = vst.msk [vmem:[%s330_s22] sm:$0xff] %vm948_vm5, %v926_v28 }
 0x356   : > { %v929_v29 = vpop.xlane.xlu1 %928 }
 0x357   : > { %950 = vst.msk [vmem:[%s330_s22 + $0x8] sm:$0xff] %vm948_vm5, %v929_v29 }
 0x35c   : > { %v932_v30 = vpop.xlane.xlu0 %931 }
 0x35d   : > { %951 = vst.msk [vmem:[%s330_s22 + $0x10] sm:$0xff] %vm948_vm5, %v932_v30 }
 0x360   : > { %v935_v31 = vpop.xlane.xlu0 %934 }
 0x361   : > { %952 = vst.msk [vmem:[%s330_s22 + $0x18] sm:$0xff] %vm948_vm5, %v935_v31 }
 0x364   : > { %v938_v32 = vpop.xlane.xlu1 %937 }
 0x365   : > { %953 = vst.msk [vmem:[%s330_s22 + $0x20] sm:$0xff] %vm948_vm5, %v938_v32 }
 0x366   : > { %v941_v33 = vpop.xlane.xlu0 %940 }
 0x367   : > { %954 = vst.msk [vmem:[%s330_s22 + $0x28] sm:$0xff] %vm948_vm5, %v941_v33 }
 0x36c   : > { %v944_v34 = vpop.xlane.xlu1 %943 }
 0x36d   : > { %955 = vst.msk [vmem:[%s330_s22 + $0x30] sm:$0xff] %vm948_vm5, %v944_v34 }
 0x36e   : > { %v947_v35 = vpop.xlane.xlu0 %946 }
 0x36f   : > { %956 = vst.msk [vmem:[%s330_s22 + $0x38] sm:$0xff] %vm948_vm5, %v947_v35 }
 0x370 PF: > { %s17_s26 = sadd.s32 1, %s1140_s26   ;;  %s1335_s24 = smov %s1136_s25 }
 0x371   : > { %p14_p5 = scmp.ge.s32.totalorder %s17_s26, 4   ;;  %s1336_s25 = smov %s1338_s27 }
 0x373   :  { %16 = sbr.rel (!%p14_p5) target bundleno = 2 (0x2), region = 94 }

</bundles_post_ra>
